<compile_context>
chip_gen: v7x
topology: tpu7x:2x2x1
jax: 0.10.0
libtpu: 0.0.40
codegen_flags: <defaults>
</compile_context>

<pallas_src>
import functools

import jax
import jax.numpy as jnp
from jax import lax
from jax.experimental import pallas as pl
from jax.experimental.pallas import tpu as pltpu


def _spatial_transform_kernel(x_ref, gf_ref, out_ref, *, H, W, M_pad,
                              contract_w, use_bf16):
    """x_ref: (C_t*M_pad, K); gf_ref: (4, TP); out_ref: (C_t, TP).

    contract_w=True  -> K == W (MXU contracts width),  M == H (VPU reduce).
    contract_w=False -> K == H (MXU contracts height), M == W (VPU reduce).
    """
    C_t, TP = out_ref.shape
    K = x_ref.shape[1]

    # sample_grid = clamp(sample_grid + flow, -1, 1).
    # Rows 0..1 of gf = grid (x, y), rows 2..3 = flow (x, y).
    gf = gf_ref[...].astype(jnp.float32)
    g = jnp.clip(gf[0:2, :] + gf[2:4, :], -1.0, 1.0)              # (2, TP)

    # Unnormalize (align_corners=False): p = ((c + 1) * size - 1) / 2
    px = ((g[0:1, :] + 1.0) * W - 1.0) * 0.5                      # width  coord (1, TP)
    py = ((g[1:2, :] + 1.0) * H - 1.0) * 0.5                      # height coord (1, TP)
    pk, pm = (px, py) if contract_w else (py, px)

    # Separable bilinear "hat" weights.  Out-of-range taps either fall outside
    # the iota range or hit zero-padded rows/cols of x -> exact zeros padding.
    k_idx = lax.broadcasted_iota(jnp.int32, (K, TP), 0).astype(jnp.float32)
    m_idx = lax.broadcasted_iota(jnp.int32, (M_pad, TP), 0).astype(jnp.float32)
    Bk = jnp.maximum(0.0, 1.0 - jnp.abs(k_idx - pk))              # (K, TP)     -> MXU
    Am = jnp.maximum(0.0, 1.0 - jnp.abs(m_idx - pm))              # (M_pad, TP) -> VPU

    xq = x_ref[...]
    if use_bf16:
        # bf16 MXU operands, f32 accumulation (Am multiply/reduce stays f32 —
        # v5e VPU has no bf16).
        xq = xq.astype(jnp.bfloat16)
        Bk = Bk.astype(jnp.bfloat16)
    else:
        xq = xq.astype(jnp.float32)

    # Contract the K spatial axis on the MXU: (C_t*M_pad, K) @ (K, TP).
    t = jnp.dot(xq, Bk, preferred_element_type=jnp.float32)       # (C_t*M_pad, TP)
    # Finish the M axis on the VPU + sublane reduce.  M_pad % 8 == 0 keeps the
    # reshape layout-free (no cross-sublane relayout of the intermediate).
    t = t.reshape(C_t, M_pad, TP) * Am[None, :, :]
    out_ref[...] = jnp.sum(t, axis=1).astype(out_ref.dtype)


def _vmem_capacity_bytes():
    """Generation-aware VMEM capacity with a conservative (v7x) fallback."""
    try:
        cap = getattr(pltpu.get_tpu_info(), "vmem_capacity_bytes", None)
        if cap:
            return int(cap)
    except Exception:
        pass
    return 64 * 1024 * 1024


def _pick_ct(C, bytes_per_channel, budget):
    """Channel-group tile: divides C; keeps the (C_t, TP) out block layout legal
    (second-minor dim must equal C or be a multiple of 8)."""
    cands = [ct for ct in range(C, 0, -1)
             if C % ct == 0 and (ct == C or ct % 8 == 0)]
    for ct in cands:
        if ct * bytes_per_channel <= budget:
            return ct
    return cands[-1]


def _pick_tp(P_pad, per_tp_bytes, avail_bytes, max_tp):
    """Lane tile over output pixels: a multiple of 128 dividing P_pad, VMEM-bounded."""
    tp = int(min(max_tp, P_pad, max(avail_bytes // max(per_tp_bytes, 1), 128)))
    tp = max(tp - tp % 128, 128)
    while P_pad % tp != 0:
        tp -= 128
    return tp


def spatial_transform(x, flow, sample_grid, *, use_bf16_mxu=False, max_tp=1024):
    """x: (N,C,H,W); flow, sample_grid: (N,Ho,Wo,2), [...,0]=x-coord, [...,1]=y-coord.
    Returns (N,C,Ho,Wo) == F.grid_sample(x, clamp(grid+flow,-1,1), bilinear,
    zeros padding, align_corners=False)."""
    N, C, H, W = x.shape
    _, Ho, Wo, _ = sample_grid.shape
    P = Ho * Wo

    # ---- layout plumbing (plain JAX, fused by XLA around the kernel) ----
    # Contract the larger spatial axis on the MXU.
    contract_w = W >= H
    x_r = x if contract_w else jnp.transpose(x, (0, 1, 3, 2))      # (N, C, M, K)
    M, K = x_r.shape[2], x_r.shape[3]
    M_pad = -(-M // 8) * 8                      # sublane-pad the VPU-reduced axis
    if M_pad != M:
        x_r = jnp.pad(x_r, ((0, 0), (0, 0), (0, M_pad - M), (0, 0)))
    x_flat = x_r.reshape(N, C * M_pad, K)

    # Stack grid & flow into one (N, 4, P) operand.
    grid_flat = jnp.transpose(sample_grid.reshape(N, P, 2), (0, 2, 1)).astype(jnp.float32)
    flow_flat = jnp.transpose(flow.reshape(N, P, 2), (0, 2, 1)).astype(jnp.float32)
    gridflow = jnp.concatenate([grid_flat, flow_flat], axis=1)     # (N, 4, P)

    # Lane-dense output: pad P up to a multiple of 128, slice back afterwards.
    P_pad = -(-P // 128) * 128
    if P_pad != P:
        gridflow = jnp.pad(gridflow, ((0, 0), (0, 0), (0, P_pad - P)))

    # ---- generation-aware VMEM sizing ----
    vmem_cap = _vmem_capacity_bytes()
    vmem_limit = min(vmem_cap * 3 // 4, 100 * 1024 * 1024)
    itemsize = x_flat.dtype.itemsize
    out_itemsize = x.dtype.itemsize

    C_t = _pick_ct(C, M_pad * K * itemsize, vmem_limit // 2)
    x_block_bytes = C_t * M_pad * K * itemsize
    # x only changes at (n, c) boundaries; single-buffer it when it is large
    # (re-fetch exposure is one step per (n, c) pair).  Matters most on v7x.
    single_buffer_x = x_block_bytes > 8 * 1024 * 1024
    x_buffers = 1 if single_buffer_x else 2

    per_tp_bytes = (8 * C_t * M_pad             # f32 matmul result + Am-scaled copy
                    + 4 * (K + M_pad + 16)      # hat weights + coordinate temps
                    + 2 * 4 * 4                 # gridflow tile, double-buffered
                    + 2 * C_t * out_itemsize)   # out tile, double-buffered
    avail = max(vmem_limit - x_buffers * x_block_bytes - (2 << 20), 0)
    TP = _pick_tp(P_pad, per_tp_bytes, avail, max_tp)
    n_c, n_p = C // C_t, P_pad // TP

    # Megacore: prefer splitting over batch/channel (keeps x private per core);
    # only let the p axis be split when there is nothing else to split.
    p_sem = "parallel" if (N * n_c) == 1 else "arbitrary"
    dims = ("parallel", "parallel", p_sem)

    x_spec_kwargs = dict(pipeline_mode=pl.Buffered(1)) if single_buffer_x else {}
    kernel = functools.partial(_spatial_transform_kernel, H=H, W=W, M_pad=M_pad,
                               contract_w=contract_w, use_bf16=use_bf16_mxu)

    flops = 2 * N * C * M_pad * K * P_pad + 3 * N * C * M_pad * P_pad
    bytes_accessed = (x_flat.size * x_flat.dtype.itemsize
                      + gridflow.size * gridflow.dtype.itemsize
                      + N * C * P_pad * out_itemsize)

    out_flat = pl.pallas_call(
        kernel,
        out_shape=jax.ShapeDtypeStruct((N, C, P_pad), x.dtype),
        grid_spec=pltpu.PrefetchScalarGridSpec(
            num_scalar_prefetch=0,
            grid=(N, n_c, n_p),
            in_specs=[
                pl.BlockSpec((None, C_t * M_pad, K), lambda n, c, p: (n, c, 0),
                             **x_spec_kwargs),
                pl.BlockSpec((None, 4, TP), lambda n, c, p: (n, 0, p)),
            ],
            out_specs=pl.BlockSpec((None, C_t, TP), lambda n, c, p: (n, c, p)),
        ),
        compiler_params=pltpu.CompilerParams(
            dimension_semantics=dims,
            vmem_limit_bytes=int(vmem_limit),
        ),
        cost_estimate=pl.CostEstimate(
            flops=flops, transcendentals=0, bytes_accessed=bytes_accessed),
    )(x_flat, gridflow)

    return out_flat[:, :, :P].reshape(N, C, Ho, Wo)


def _grid_sample_ref(x, grid):
    """Pure-JAX reference: F.grid_sample bilinear, zeros padding, align_corners=False."""
    N, C, H, W = x.shape

    def one(xn, gn):
        gx, gy = gn[..., 0], gn[..., 1]
        px = ((gx + 1.0) * W - 1.0) * 0.5
        py = ((gy + 1.0) * H - 1.0) * 0.5
        x0 = jnp.floor(px).astype(jnp.int32)
        y0 = jnp.floor(py).astype(jnp.int32)
        out = jnp.zeros((C,) + gx.shape, jnp.float32)
        for dy in (0, 1):
            for dx in (0, 1):
                xi, yi = x0 + dx, y0 + dy
                wx = (px - x0) if dx == 1 else (x0 + 1.0 - px)
                wy = (py - y0) if dy == 1 else (y0 + 1.0 - py)
                valid = (xi >= 0) & (xi < W) & (yi >= 0) & (yi < H)
                xic = jnp.clip(xi, 0, W - 1)
                yic = jnp.clip(yi, 0, H - 1)
                v = xn[:, yic, xic]                       # (C, Ho, Wo)
                out = out + v * (wx * wy * valid)[None]
        return out

    return jax.vmap(one)(x, grid).astype(x.dtype)


def _identity_grid(n, ho, wo):
    ys = jnp.linspace(-1.0, 1.0, ho)
    xs = jnp.linspace(-1.0, 1.0, wo)
    gy, gx = jnp.meshgrid(ys, xs, indexing="ij")
    g = jnp.stack([gx, gy], axis=-1)                      # PyTorch: [...,0]=x, [...,1]=y
    return jnp.broadcast_to(g, (n, ho, wo, 2)).astype(jnp.float32)


if __name__ == "__main__":
    key = jax.random.PRNGKey(0)
    k1, k2, k3, k4, k5 = jax.random.split(key, 5)

    # Case 1: same-resolution sampling, square image (MXU contracts W).
    N, C, H, W = 2, 4, 16, 16
    x = jax.random.normal(k1, (N, C, H, W), dtype=jnp.float32)
    grid1 = _identity_grid(N, H, W)
    flow1 = 0.2 * jax.random.normal(k2, (N, H, W, 2), dtype=jnp.float32)
    out1 = jax.block_until_ready(spatial_transform(x, flow1, grid1))
    ref1 = _grid_sample_ref(x, jnp.clip(grid1 + flow1, -1.0, 1.0))
    assert out1.shape == (N, C, H, W)
    assert jnp.allclose(out1, ref1, rtol=1e-5, atol=1e-5), \
        float(jnp.max(jnp.abs(out1 - ref1)))

    # Case 2: different output resolution, multi-tile p axis (max_tp=384 -> 2 tiles).
    Ho, Wo = 24, 32
    grid2 = _identity_grid(N, Ho, Wo)
    flow2 = 0.2 * jax.random.normal(k3, (N, Ho, Wo, 2), dtype=jnp.float32)
    out2 = jax.block_until_ready(spatial_transform(x, flow2, grid2, max_tp=384))
    ref2 = _grid_sample_ref(x, jnp.clip(grid2 + flow2, -1.0, 1.0))
    assert out2.shape == (N, C, Ho, Wo)
    assert jnp.allclose(out2, ref2, rtol=1e-5, atol=1e-5), \
        float(jnp.max(jnp.abs(out2 - ref2)))

    # Case 3: H > W (MXU contracts H), odd C, W sublane-padded, P lane-padded.
    N3, C3, H3, W3, Ho3, Wo3 = 1, 3, 20, 12, 8, 8
    x3 = jax.random.normal(k4, (N3, C3, H3, W3), dtype=jnp.float32)
    grid3 = _identity_grid(N3, Ho3, Wo3)
    flow3 = 0.15 * jax.random.normal(k5, (N3, Ho3, Wo3, 2), dtype=jnp.float32)
    out3 = jax.block_until_ready(spatial_transform(x3, flow3, grid3))
    ref3 = _grid_sample_ref(x3, jnp.clip(grid3 + flow3, -1.0, 1.0))
    assert out3.shape == (N3, C3, Ho3, Wo3)
    assert jnp.allclose(out3, ref3, rtol=1e-5, atol=1e-5), \
        float(jnp.max(jnp.abs(out3 - ref3)))

    # Case 4: bf16 MXU operands (perf option) at relaxed tolerance.
    out4 = jax.block_until_ready(spatial_transform(x, flow1, grid1, use_bf16_mxu=True))
    assert jnp.allclose(out4, ref1, rtol=5e-2, atol=5e-2), \
        float(jnp.max(jnp.abs(out4 - ref1)))

    print("KERNEL_OK")
</pallas_src>

<mosaic_0001>
module attributes {stable_mosaic.version = 11 : i64} {
  func.func @_spatial_transform_kernel(%arg0: i32, %arg1: i32, %arg2: i32, %arg3: memref<1x64x16xf32, #tpu.memory_space<vmem>>, %arg4: memref<1x4x256xf32, #tpu.memory_space<vmem>>, %arg5: memref<1x4x256xf32, #tpu.memory_space<vmem>>) attributes {dimension_semantics = [#tpu.dimension_semantics<parallel>, #tpu.dimension_semantics<parallel>, #tpu.dimension_semantics<arbitrary>], iteration_bounds = array<i64: 2, 1, 1>, scalar_prefetch = 0 : i64, scratch_operands = 0 : i64, tpu.core_type = #tpu.core_type<tc>, window_params = [{transform_indices = @transform_0, window_bounds = array<i64: 1, 64, 16>}, {transform_indices = @transform_1, window_bounds = array<i64: 1, 4, 256>}, {transform_indices = @transform_2, window_bounds = array<i64: 1, 4, 256>}]} {
    %c0 = arith.constant 0 : index
    %c0_0 = arith.constant 0 : index
    %c0_1 = arith.constant 0 : index
    %0 = vector.load %arg4[%c0, %c0_0, %c0_1] : memref<1x4x256xf32, #tpu.memory_space<vmem>>, vector<1x4x256xf32>
    %1 = vector.shape_cast %0 : vector<1x4x256xf32> to vector<4x256xf32>
    %2 = vector.extract_strided_slice %1 {offsets = [0, 0], sizes = [2, 256], strides = [1, 1]} : vector<4x256xf32> to vector<2x256xf32>
    %3 = vector.extract_strided_slice %1 {offsets = [2, 0], sizes = [2, 256], strides = [1, 1]} : vector<4x256xf32> to vector<2x256xf32>
    %4 = arith.addf %2, %3 : vector<2x256xf32>
    %cst = arith.constant -1.000000e+00 : f32
    %cst_2 = arith.constant 1.000000e+00 : f32
    %5 = vector.broadcast %cst : f32 to vector<2x256xf32>
    %6 = arith.maximumf %5, %4 : vector<2x256xf32>
    %7 = vector.broadcast %cst_2 : f32 to vector<2x256xf32>
    %8 = arith.minimumf %7, %6 : vector<2x256xf32>
    %9 = vector.extract_strided_slice %8 {offsets = [0, 0], sizes = [1, 256], strides = [1, 1]} : vector<2x256xf32> to vector<1x256xf32>
    %cst_3 = arith.constant 1.000000e+00 : f32
    %10 = vector.broadcast %cst_3 : f32 to vector<1x256xf32>
    %11 = arith.addf %9, %10 : vector<1x256xf32>
    %cst_4 = arith.constant 1.600000e+01 : f32
    %12 = vector.broadcast %cst_4 : f32 to vector<1x256xf32>
    %13 = arith.mulf %11, %12 : vector<1x256xf32>
    %cst_5 = arith.constant 1.000000e+00 : f32
    %14 = vector.broadcast %cst_5 : f32 to vector<1x256xf32>
    %15 = arith.subf %13, %14 : vector<1x256xf32>
    %cst_6 = arith.constant 5.000000e-01 : f32
    %16 = vector.broadcast %cst_6 : f32 to vector<1x256xf32>
    %17 = arith.mulf %15, %16 : vector<1x256xf32>
    %18 = vector.extract_strided_slice %8 {offsets = [1, 0], sizes = [1, 256], strides = [1, 1]} : vector<2x256xf32> to vector<1x256xf32>
    %cst_7 = arith.constant 1.000000e+00 : f32
    %19 = vector.broadcast %cst_7 : f32 to vector<1x256xf32>
    %20 = arith.addf %18, %19 : vector<1x256xf32>
    %cst_8 = arith.constant 1.600000e+01 : f32
    %21 = vector.broadcast %cst_8 : f32 to vector<1x256xf32>
    %22 = arith.mulf %20, %21 : vector<1x256xf32>
    %cst_9 = arith.constant 1.000000e+00 : f32
    %23 = vector.broadcast %cst_9 : f32 to vector<1x256xf32>
    %24 = arith.subf %22, %23 : vector<1x256xf32>
    %cst_10 = arith.constant 5.000000e-01 : f32
    %25 = vector.broadcast %cst_10 : f32 to vector<1x256xf32>
    %26 = arith.mulf %24, %25 : vector<1x256xf32>
    %27 = tpu.iota {dimensions = array<i32: 0>} : vector<16x256xi32>
    %28 = arith.sitofp %27 : vector<16x256xi32> to vector<16x256xf32>
    %29 = tpu.iota {dimensions = array<i32: 0>} : vector<16x256xi32>
    %30 = arith.sitofp %29 : vector<16x256xi32> to vector<16x256xf32>
    %31 = vector.broadcast %17 : vector<1x256xf32> to vector<16x256xf32>
    %32 = arith.subf %28, %31 : vector<16x256xf32>
    %33 = math.absf %32 : vector<16x256xf32>
    %cst_11 = arith.constant 1.000000e+00 : f32
    %34 = vector.broadcast %cst_11 : f32 to vector<16x256xf32>
    %35 = arith.subf %34, %33 : vector<16x256xf32>
    %cst_12 = arith.constant 0.000000e+00 : f32
    %36 = vector.broadcast %cst_12 : f32 to vector<16x256xf32>
    %37 = arith.maximumf %36, %35 : vector<16x256xf32>
    %38 = vector.broadcast %26 : vector<1x256xf32> to vector<16x256xf32>
    %39 = arith.subf %30, %38 : vector<16x256xf32>
    %40 = math.absf %39 : vector<16x256xf32>
    %cst_13 = arith.constant 1.000000e+00 : f32
    %41 = vector.broadcast %cst_13 : f32 to vector<16x256xf32>
    %42 = arith.subf %41, %40 : vector<16x256xf32>
    %cst_14 = arith.constant 0.000000e+00 : f32
    %43 = vector.broadcast %cst_14 : f32 to vector<16x256xf32>
    %44 = arith.maximumf %43, %42 : vector<16x256xf32>
    %c0_15 = arith.constant 0 : index
    %c0_16 = arith.constant 0 : index
    %c0_17 = arith.constant 0 : index
    %45 = vector.load %arg3[%c0_15, %c0_16, %c0_17] : memref<1x64x16xf32, #tpu.memory_space<vmem>>, vector<1x64x16xf32>
    %46 = vector.shape_cast %45 : vector<1x64x16xf32> to vector<64x16xf32>
    %cst_18 = arith.constant dense<0.000000e+00> : vector<64x256xf32>
    %47 = tpu.matmul %46, %37, %cst_18 {dimension_numbers = #tpu.dot_dimension_numbers<[1], [0], [0], [1], [0, 0, 1, 1], [], []>} : vector<64x16xf32>, vector<16x256xf32>, vector<64x256xf32> -> vector<64x256xf32>
    %48 = vector.shape_cast %47 : vector<64x256xf32> to vector<4x16x256xf32>
    %49 = vector.shape_cast %44 : vector<16x256xf32> to vector<1x16x256xf32>
    %50 = vector.broadcast %49 : vector<1x16x256xf32> to vector<4x16x256xf32>
    %51 = arith.mulf %48, %50 : vector<4x16x256xf32>
    %cst_19 = arith.constant dense<0.000000e+00> : vector<4x256xf32>
    %52 = vector.multi_reduction <add>, %51, %cst_19 [1] : vector<4x16x256xf32> to vector<4x256xf32>
    %c0_20 = arith.constant 0 : index
    %c0_21 = arith.constant 0 : index
    %c0_22 = arith.constant 0 : index
    %53 = vector.load %arg5[%c0_20, %c0_21, %c0_22] : memref<1x4x256xf32, #tpu.memory_space<vmem>>, vector<1x4x256xf32>
    %54 = vector.shape_cast %53 : vector<1x4x256xf32> to vector<4x256xf32>
    %55 = vector.shape_cast %52 : vector<4x256xf32> to vector<1x4x256xf32>
    tpu.vector_store %arg5[%c0_20, %c0_21, %c0_22], %55 {strides = array<i32>} : memref<1x4x256xf32, #tpu.memory_space<vmem>>, vector<1x4x256xf32>,
    return
  }
  func.func @transform_0(%arg0: i32, %arg1: i32, %arg2: i32) -> (i32, i32, i32) {
    %c0_i32 = arith.constant 0 : i32
    %c0_i32_0 = arith.constant 0 : i32
    return %arg0, %arg1, %c0_i32 : i32, i32, i32
  }
  func.func @transform_1(%arg0: i32, %arg1: i32, %arg2: i32) -> (i32, i32, i32) {
    %c0_i32 = arith.constant 0 : i32
    %c0_i32_0 = arith.constant 0 : i32
    return %arg0, %c0_i32, %arg2 : i32, i32, i32
  }
  func.func @transform_2(%arg0: i32, %arg1: i32, %arg2: i32) -> (i32, i32, i32) {
    %c0_i32 = arith.constant 0 : i32
    return %arg0, %arg1, %arg2 : i32, i32, i32
  }
}

</mosaic_0001>

<bundles_post_ra>
// kernel: tpu_custom_call.1
= control target key start
LH: loop header
LB: loop body
LE: loop exit
PB: predicated region body
PF: predicated region fallthrough
CT: control target
= control target key end

     0   :  { %7 = vsyncpa [#allocation3], 0  ;;  %s1012_s0 = inlined_call_operand.vmem [shape: f32[2,64,16], index: 0, kind: input, shape index: {}]   ;;  %s1013_s1 = inlined_call_operand.vmem [shape: f32[2,4,256], index: 1, kind: input, shape index: {}]   ;;  %s1014_s2 = inlined_call_operand.hbm [shape: f32[2,4,256], index: 2, kind: output, shape index: {}]  }
   0x1   :  { %9 = vsyncpa [#allocation3 + $0x1], 0  ;;  %s857_s9 = smov 0   ;;  %s859_s10 = smov 0  }
   0x2   :  { %s861_s11 = smov 0   ;;  %s863_s12 = smov 0  }
   0x3   :  { %s865_s13 = smov 0   ;;  %s867_s14 = smov 0  }
   0x4 LB: > { %s669_s15 = sadd.s32 4294967295, %s838_s14   ;;  %s670_s16 = sadd.s32 4294967294, %s838_s14   ;;  %s838_s14 = sphi %s867_s14, %s15_s14   ;;  %s834_s13 = sphi %s865_s13, %s1021_s13   ;;  %s830_s12 = sphi %s863_s12, %s1020_s12   ;;  %s826_s11 = sphi %s861_s11, %s1019_s11   ;;  %s822_s10 = sphi %s859_s10, %s1018_s10   ;;  %s818_s9 = sphi %s857_s9, %s1017_s9  }
   0x5   : > { %s34_s17 = sadd.s32 1, %s834_s13  ;;  %s101_s18 = sadd.s32 1, %s826_s11 }
   0x6   : > { %p36_p0 = scmp.ge.s32.totalorder %s34_s17, 2  ;;  %p111_p1 = scmp.ne.s32.totalorder %s826_s11, %s822_s10 }
   0x7   : > { %p112_p2 = scmp.eq.s32.totalorder %s669_s15, 1  ;;  %p117_p3 = scmp.ne.s32.totalorder %s822_s10, %s818_s9 }
   0x8   : > { %s1023_s17 = smov (%p36_p0, %s34_s17), 0  ;;  %p118_p5 = scmp.eq.s32.totalorder %s670_s16, 1 }
   0x9   : > { %p897_p4 = por %p112_p2, %p111_p1  ;;  %s94_s20 = ssub.s32 %s834_s13, %s1023_s17 }
   0xa   : > { %p673_p6 = scmp.ge.s32.totalorder %s838_s14, 1  ;;  %p99_p7 = scmp.eq.s32.totalorder %s94_s20, 0 }
   0xb   : > { %p904_p8 = por %p118_p5, %p117_p3  ;;  %p162_p9 = scmp.lt.s32.totalorder %s838_s14, 3 }
   0xc   : > { %s910_s22 = scalar_select %p99_p7, %s826_s11, %s101_s18  }
   0xd   : > { %p163_p10 = pnand %p673_p6, %p162_p9 }
   0xe   : > { %p198_p11 = scmp.lt.s32.totalorder (!%p163_p10), %s830_s12, 1  ;;  %v840_v0 = vmov (!%p163_p10), 0.0   ;;  %v230_v4 = vlaneseq (!%p163_p10)  ;;  %vm312_vm0 = vcmask (!%p163_p10), 130048   ;;  %s194_s4 = sand.u32 (!%p163_p10), 1, %s822_s10   ;;  %vm535_vm1 = vcmask (!%p163_p10), 1041409  }
   0xf   : > { %166 = sbr.rel (%p163_p10) target bundleno = 324 (0x144), region = 28  ;;  %401 = vmatprep.mubr.f32.mxu0 (!%p163_p10), %v840_v0  ;;  %425 = vmatprep.mubr.f32.mxu1 (!%p163_p10), %v840_v0  ;;  %s674_s5 = sshll.u32 (!%p163_p10), %s194_s4, 3  ;;  %vm537_vm2 = vcmask (!%p163_p10), 1045509   ;;  %vm540_vm3 = vcmask (!%p163_p10), 1042434   ;;  %vm542_vm4 = vcmask (!%p163_p10), 1046534   ;;  %vm545_vm5 = vcmask (!%p163_p10), 1043459  }
  0x10   : > { %v922_v7 = vshrl.u32 (!%p163_p10), %v230_v4, 7  ;;  %s697_s6 = sshll.u32 (!%p163_p10), %s830_s12, 7  ;;  %s196_s7 = scalar_lea.vmem (!%p163_p10), [#allocation2], %s674_s5  ;;  %vm547_vm6 = vcmask (!%p163_p10), 1047559  }
  0x11   : > { %s570_s8 = sshll.u32 (!%p163_p10), %s196_s7, 4  ;;  %s965_s18 = scalar_lea.hbm (!%p163_p10), %s1014_s2, %s697_s6  ;;  %s967_s8 = int_to_ptr.vmem [resolvable:$true] %s570_s8 }
  0x12   : > { %v232_v10 = vadd.s32 (!%p163_p10), 8, %v922_v7  ;;  %v238_v11 = vsub.s32 (!%p163_p10), 0, %v922_v7  ;;  %v242_v12 = vsub.s32 (!%p163_p10), 4, %v922_v7  ;;  %v928_v14 = vcvt.s32.f32 (!%p163_p10), %v922_v7  ;;  %s760_s20 = scalar_lea.vmem (!%p163_p10), %s967_s8, 128 }
  0x13   : > { %v272_v46 = vsub.s32 (!%p163_p10), 1, %v922_v7  ;;  %v276_v47 = vsub.s32 (!%p163_p10), 5, %v922_v7  ;;  %p761_p12 = scmp.ne.s32.totalorder (!%p163_p10), %s967_s8, %s760_s20 }
  0x14   : > { %v930_v15 = vcvt.s32.f32 (!%p163_p10), %v232_v10 }
  0x15   : > { %p762_p13 = pnand (!%p163_p10), %p761_p12, %p897_p4 }
  0x16   : > { %s916_s23 = scalar_select %p198_p11, %s830_s12, 1 }
  0x17   : > { %s552_s12 = scalar_lea.sflag [#allocation3], %s194_s4  ;;  %p763_p0 = pneg %p762_p13 }
  0x18   : > { %s696_s24 = sshll.u32 %s916_s23, 3  ;;  %s695_s28 = sshll.u32 %s916_s23, 6 }
  0x19   : > { %s215_s27 = scalar_lea.vmem %s1013_s1, %s696_s24  ;;  %s205_s3 = scalar_lea.vmem %s1012_s0, %s695_s28 }
  0x1a   : > { %v218_v1 = vld [vmem:[%s215_s27] sm:$0xff]  ;;  %v305_v40 = vld [vmem:[%s205_s3 + $0x8] sm:$0xff]  ;;  %v306_v42 = vld [vmem:[%s205_s3 + $0x10] sm:$0xff]  ;;  %s841_s23 = smov [#allocation2]  }
  0x1b   : > { %v679_v2 = vrot.slane %v218_v1, 10  ;;  %v304_v38 = vld [vmem:[%s205_s3] sm:$0xff]  ;;  %v309_v41 = vld [vmem:[%s205_s3 + $0x28] sm:$0xff]  ;;  %v310_v43 = vld [vmem:[%s205_s3 + $0x30] sm:$0xff]  ;;  %s764_s24 = sshll.u32 %s841_s23, 4  ;;  %s765_s24 = int_to_ptr.vmem [resolvable:$false] %s764_s24 }
  0x1c   : > { %v308_v39 = vld [vmem:[%s205_s3 + $0x20] sm:$0xff]  ;;  %v307_v44 = vld [vmem:[%s205_s3 + $0x18] sm:$0xff]  ;;  %s766_s25 = scalar_lea.vmem %s765_s24, 256  ;;  %p767_p1 = scmp.lt.s32.totalorder %s967_s8, %s765_s24 }
  0x1d   : > { %v223_v3 = vadd.f32 %v679_v2, %v218_v1  ;;  %v311_v45 = vld [vmem:[%s205_s3 + $0x38] sm:$0xff]  ;;  %p768_p2 = scmp.lt.s32.totalorder %s766_s25, %s760_s20 }
  0x1f   : > { %v680_v5 = vclamps-f32 %v223_v3, 1.0  ;;  %p769_p3 = por %p768_p2, %p767_p1 }
  0x21   : > { %v226_v6 = vadd.f32 1.0, %v680_v5  ;;  %p770_p5 = pnand %p769_p3, %p763_p0 }
  0x23   : > { %v227_v8 = vmul.f32 16.0, %v226_v6 }
  0x25   : > { %v681_v9 = vadd.f32 -1.0, %v227_v8 }
  0x27   : > { %v229_v13 = vmul.f32 0.5, %v681_v9 }
  0x29   : > { %v243_v16 = vrot.slane %v229_v13, %v242_v12  ;;  %v239_v17 = vrot.slane %v229_v13, %v238_v11  ;;  %v273_v48 = vrot.slane %v229_v13, %v272_v46  ;;  %v277_v49 = vrot.slane %v229_v13, %v276_v47 }
  0x2b   : > { %v253_v18 = vrot.slane %v243_v16, %v238_v11  ;;  %v249_v19 = vrot.slane %v239_v17, %v238_v11  ;;  %v283_v50 = vrot.slane %v273_v48, %v272_v46  ;;  %v287_v51 = vrot.slane %v277_v49, %v272_v46 }
  0x2d   : > { %v255_v20 = vsub.f32 %v928_v14, %v253_v18  ;;  %v257_v21 = vsub.f32 %v930_v15, %v253_v18  ;;  %v254_v22 = vsub.f32 %v928_v14, %v249_v19  ;;  %v256_v23 = vsub.f32 %v930_v15, %v249_v19 }
  0x2e   : > { %v288_v52 = vsub.f32 %v928_v14, %v283_v50  ;;  %v290_v53 = vsub.f32 %v930_v15, %v283_v50  ;;  %v289_v54 = vsub.f32 %v928_v14, %v287_v51  ;;  %v291_v55 = vsub.f32 %v930_v15, %v287_v51 }
  0x2f   : > { %v259_v24 = vand.u32 2147483647, %v255_v20  ;;  %v261_v25 = vand.u32 2147483647, %v257_v21  ;;  %v258_v26 = vand.u32 2147483647, %v254_v22 }
  0x30   : > { %v260_v27 = vand.u32 2147483647, %v256_v23  ;;  %v292_v56 = vand.u32 2147483647, %v288_v52  ;;  %v294_v57 = vand.u32 2147483647, %v290_v53 }
  0x31   : > { %v263_v28 = vsub.f32 1.0, %v259_v24  ;;  %v265_v29 = vsub.f32 1.0, %v261_v25  ;;  %v262_v30 = vsub.f32 1.0, %v258_v26  ;;  %v293_v58 = vand.u32 2147483647, %v289_v54 }
  0x32   : > { %v264_v31 = vsub.f32 1.0, %v260_v27  ;;  %v295_v59 = vand.u32 2147483647, %v291_v55  ;;  %v296_v60 = vsub.f32 1.0, %v292_v56  ;;  %v298_v61 = vsub.f32 1.0, %v294_v57 }
  0x33   : > { %v267_v32 = vmax.f32 %v263_v28, 0.0  ;;  %v269_v33 = vmax.f32 %v265_v29, 0.0  ;;  %v266_v34 = vmax.f32 %v262_v30, 0.0  ;;  %v297_v62 = vsub.f32 1.0, %v293_v58 }
  0x34   : > { %v268_v35 = vmax.f32 %v264_v31, 0.0  ;;  %v299_v63 = vsub.f32 1.0, %v295_v59  ;;  %v300_v2 = vmax.f32 %v296_v60, 0.0  ;;  %v302_v5 = vmax.f32 %v298_v61, 0.0 }
  0x35   : > { %v698_v36 = vpack.c.bf16 %v269_v33, %v267_v32  ;;  %v301_v6 = vmax.f32 %v297_v62, 0.0 }
  0x36   : > { %v700_v37 = vpack.c.bf16 %v268_v35, %v266_v34  ;;  %v303_v7 = vmax.f32 %v299_v63, 0.0 }
  0x37   : > { %699 = vmatprep.subr.bf16.mxu0 %v698_v36  ;;  %702 = vmatprep.subr.bf16.mxu1 %v698_v36 }
  0x38   : > { %701 = vmatpush1.bf16.msra.mxu0 %v700_v37  ;;  %703 = vmatpush1.bf16.msra.mxu1 %v700_v37 }
  0x3b   : > { %682 = vmatmul.mubr.msk.f32.vlgmr.msra.gmra.mrb[0].mxu0 %vm312_vm0, %v304_v38  ;;  %686 = vmatmul.mubr.msk.f32.vlgmr.msra.gmra.mrb[0].mxu1 %vm312_vm0, %v308_v39 }
  0x3c   : > { %407 = vmatprep.mubr.f32.mxu0 %v840_v0  ;;  %431 = vmatprep.mubr.f32.mxu1 %v840_v0 }
  0x3f   : > { %683 = vmatmul.mubr.msk.f32.gmra.mrb[2].mxu0 %vm312_vm0, %v305_v40  ;;  %687 = vmatmul.mubr.msk.f32.gmra.mrb[2].mxu1 %vm312_vm0, %v309_v41 }
  0x40   : > { %413 = vmatprep.mubr.f32.mxu0 %v840_v0  ;;  %437 = vmatprep.mubr.f32.mxu1 %v840_v0 }
  0x43   : > { %684 = vmatmul.mubr.msk.f32.gmra.mrb[4].mxu0 %vm312_vm0, %v306_v42  ;;  %688 = vmatmul.mubr.msk.f32.gmra.mrb[4].mxu1 %vm312_vm0, %v310_v43 }
  0x44   : > { %419 = vmatprep.mubr.f32.mxu0 %v840_v0  ;;  %443 = vmatprep.mubr.f32.mxu1 %v840_v0 }
  0x47   : > { %685 = vmatmul.mubr.msk.f32.gmra.mrb[6].mxu0 %vm312_vm0, %v307_v44  ;;  %689 = vmatmul.mubr.msk.f32.gmra.mrb[6].mxu1 %vm312_vm0, %v311_v45 }
 0x10e   : > { %v403_v0 = vpop.f32.mrb[0].mxu0  ;;  %v427_v1 = vpop.f32.mrb[0].mxu1 }
 0x10f   : > { %v405_v3 = vpop.f32.mrb[1].mxu0  ;;  %v429_v4 = vpop.f32.mrb[1].mxu1  ;;  %v458_v8 = vmul.f32 %v427_v1, %v300_v2  ;;  %v450_v12 = vmul.f32 %v403_v0, %v300_v2 }
 0x110   : > { %v459_v9 = vmul.f32 %v429_v4, %v301_v6  ;;  %v451_v17 = vmul.f32 %v405_v3, %v301_v6 }
 0x112   : > { %v409_v10 = vpop.f32.mrb[2].mxu0  ;;  %v433_v11 = vpop.f32.mrb[2].mxu1 }
 0x113   : > { %v452_v13 = vmul.f32 %v409_v10, %v302_v5  ;;  %v460_v14 = vmul.f32 %v433_v11, %v302_v5  ;;  %v411_v15 = vpop.f32.mrb[3].mxu0  ;;  %v435_v16 = vpop.f32.mrb[3].mxu1 }
 0x114   : > { %v453_v18 = vmul.f32 %v411_v15, %v303_v7  ;;  %v461_v19 = vmul.f32 %v435_v16, %v303_v7 }
 0x115   : > { %v466_v20 = vadd.f32 %v452_v13, %v450_v12  ;;  %v494_v21 = vadd.f32 %v460_v14, %v458_v8 }
 0x116   : > { %v473_v22 = vadd.f32 %v453_v18, %v451_v17  ;;  %v501_v23 = vadd.f32 %v461_v19, %v459_v9  ;;  %v415_v24 = vpop.f32.mrb[4].mxu0  ;;  %v439_v25 = vpop.f32.mrb[4].mxu1 }
 0x117   : > { %v467_v26 = vrot.slane %v466_v20, 4  ;;  %v495_v27 = vrot.slane %v494_v21, 4  ;;  %v417_v28 = vpop.f32.mrb[5].mxu0  ;;  %v441_v29 = vpop.f32.mrb[5].mxu1  ;;  %v454_v34 = vmul.f32 %v415_v24, %v300_v2  ;;  %v462_v35 = vmul.f32 %v439_v25, %v300_v2 }
 0x118   : > { %v474_v30 = vrot.slane %v473_v22, 4  ;;  %v502_v31 = vrot.slane %v501_v23, 4  ;;  %v455_v38 = vmul.f32 %v417_v28, %v301_v6  ;;  %v463_v39 = vmul.f32 %v441_v29, %v301_v6 }
 0x119   : > { %v468_v32 = vadd.f32 %v467_v26, %v466_v20  ;;  %v496_v33 = vadd.f32 %v495_v27, %v494_v21 }
 0x11a   : > { %v475_v36 = vadd.f32 %v474_v30, %v473_v22  ;;  %v503_v37 = vadd.f32 %v502_v31, %v501_v23  ;;  %v421_v40 = vpop.f32.mrb[6].mxu0  ;;  %v445_v41 = vpop.f32.mrb[6].mxu1 }
 0x11b   : > { %v469_v42 = vrot.slane %v468_v32, 2  ;;  %v497_v43 = vrot.slane %v496_v33, 2  ;;  %v456_v44 = vmul.f32 %v421_v40, %v302_v5  ;;  %v464_v45 = vmul.f32 %v445_v41, %v302_v5  ;;  %v423_v46 = vpop.f32.mrb[7].mxu0  ;;  %v447_v47 = vpop.f32.mrb[7].mxu1 }
 0x11c   : > { %v476_v48 = vrot.slane %v475_v36, 2  ;;  %v504_v49 = vrot.slane %v503_v37, 2  ;;  %v457_v50 = vmul.f32 %v423_v46, %v303_v7  ;;  %v465_v51 = vmul.f32 %v447_v47, %v303_v7 }
 0x11d   : > { %v470_v52 = vadd.f32 %v469_v42, %v468_v32  ;;  %v498_v53 = vadd.f32 %v497_v43, %v496_v33  ;;  %v480_v54 = vadd.f32 %v456_v44, %v454_v34  ;;  %v508_v55 = vadd.f32 %v464_v45, %v462_v35 }
 0x11e   : > { %v477_v56 = vadd.f32 %v476_v48, %v475_v36  ;;  %v505_v57 = vadd.f32 %v504_v49, %v503_v37  ;;  %v487_v58 = vadd.f32 %v457_v50, %v455_v38  ;;  %v515_v59 = vadd.f32 %v465_v51, %v463_v39 }
 0x11f   : > { %v471_v60 = vrot.slane %v470_v52, 1  ;;  %v499_v61 = vrot.slane %v498_v53, 1  ;;  %v481_v62 = vrot.slane %v480_v54, 4  ;;  %v509_v63 = vrot.slane %v508_v55, 4 }
 0x120   : > { %v478_v0 = vrot.slane %v477_v56, 1  ;;  %v506_v1 = vrot.slane %v505_v57, 1  ;;  %v488_v2 = vrot.slane %v487_v58, 4  ;;  %v516_v3 = vrot.slane %v515_v59, 4 }
 0x121   : > { %v472_v4 = vadd.f32 %v471_v60, %v470_v52  ;;  %v500_v5 = vadd.f32 %v499_v61, %v498_v53  ;;  %v482_v6 = vadd.f32 %v481_v62, %v480_v54  ;;  %v510_v7 = vadd.f32 %v509_v63, %v508_v55 }
 0x122   : > { %v479_v8 = vadd.f32 %v478_v0, %v477_v56  ;;  %v507_v9 = vadd.f32 %v506_v1, %v505_v57  ;;  %v489_v10 = vadd.f32 %v488_v2, %v487_v58  ;;  %v517_v11 = vadd.f32 %v516_v3, %v515_v59 }
 0x123   : > { %v483_v12 = vrot.slane %v482_v6, 2  ;;  %v511_v13 = vrot.slane %v510_v7, 2 }
 0x124   : > { %v530_v14 = vcombine.low %v472_v4, %v479_v8  ;;  %v532_v15 = vcombine.low %v500_v5, %v507_v9  ;;  %v490_v16 = vrot.slane %v489_v10, 2  ;;  %v518_v17 = vrot.slane %v517_v11, 2 }
 0x125   : > { %v484_v18 = vadd.f32 %v483_v12, %v482_v6  ;;  %v512_v19 = vadd.f32 %v511_v13, %v510_v7 }
 0x126   : > { %v491_v20 = vadd.f32 %v490_v16, %v489_v10  ;;  %v519_v21 = vadd.f32 %v518_v17, %v517_v11  ;;  %v539_v33 = vrot.slane %v532_v15, 6 }
 0x127   : > { %v485_v22 = vrot.slane %v484_v18, 1  ;;  %v513_v23 = vrot.slane %v512_v19, 1 }
 0x128   : > { %v492_v24 = vrot.slane %v491_v20, 1  ;;  %v520_v25 = vrot.slane %v519_v21, 1 }
 0x129   : > { %v486_v26 = vadd.f32 %v485_v22, %v484_v18  ;;  %v514_v27 = vadd.f32 %v513_v23, %v512_v19 }
 0x12a   : > { %v493_v28 = vadd.f32 %v492_v24, %v491_v20  ;;  %v521_v29 = vadd.f32 %v520_v25, %v519_v21 }
 0x12c   : > { %v531_v30 = vcombine.low %v486_v26, %v493_v28  ;;  %v533_v31 = vcombine.low %v514_v27, %v521_v29 }
 0x12e   : > { %v534_v32 = vrot.slane %v531_v30, 7  ;;  %v544_v37 = vrot.slane %v533_v31, 5 }
 0x130   : > { %v536_v34 = vsel %vm535_vm1, %v534_v32, %v530_v14 }
 0x131   : > { %v538_v35 = vsel %vm537_vm2, %v534_v32, %v536_v34 }
 0x132   : > { %v541_v36 = vsel %vm540_vm3, %v539_v33, %v538_v35 }
 0x133   : > { %v543_v38 = vsel %vm542_vm4, %v539_v33, %v541_v36 }
 0x134   : > { %v546_v39 = vsel %vm545_vm5, %v544_v37, %v543_v38 }
 0x135   : > { %v548_v40 = vsel %vm547_vm6, %v544_v37, %v546_v39 }
 0x136   : > { %550 = vst [vmem:[%s196_s7] sm:$0xff] %v548_v40 }
 0x137   : > { %773 = shalt.err (!%p770_p5)
}
 0x138   : > { %s774_s26 = scalar_lea.hbm %s965_s18, 128  ;;  %s778_s29 = scalar_lea.hbm %s1014_s2, 256 }
 0x139   : > { %p775_p6 = scmp.ne.s32.totalorder %s965_s18, %s774_s26  ;;  %p779_p10 = scmp.lt.u32.totalorder %s965_s18, %s1014_s2 }
 0x13a   : > { %p780_p11 = scmp.lt.u32.totalorder %s778_s29, %s774_s26  ;;  %p782_p13 = scmp.lt.u32.totalorder %s774_s26, %s965_s18 }
 0x13b   : > { %p776_p7 = pnand %p775_p6, %p897_p4 }
 0x13c   : > { %p781_p12 = por %p780_p11, %p779_p10 }
 0x13d   : > { %p777_p9 = pneg %p776_p7 }
 0x13e   : > { %p783_p0 = por %p782_p13, %p781_p12 }
 0x140   : > { %p784_p1 = pnand %p783_p0, %p777_p9 }
 0x142   : > { %787 = shalt.err (!%p784_p1)
}
 0x143   : > { %704 = dma.vmem_to_hbm [thread:$0]  (%p897_p4), %s967_s8, 128, %s965_s18, %s552_s12  }
 0x144 PF: > { %p710_p2 = scmp.ge.s32.totalorder %s838_s14, 2  ;;  %s582_s4 = sand.u32 1, %s818_s9  }
 0x145   : > { %s583_s5 = scalar_lea.sflag [#allocation3], %s582_s4 }
 0x146   : > { %p707_p3 = pnand %p710_p2, %p904_p8 }
 0x148   : > { %813 = dma.done.wait (!%p707_p3), %s583_s5, 128  }
 0x149   : > { %815 = vsyncadd (!%p707_p3), %s583_s5, 4294967168  ;;  %s15_s14 = sadd.s32 1, %s838_s14   ;;  %s1017_s9 = smov %s822_s10 }
 0x14a   : > { %p12_p5 = scmp.ge.s32.totalorder %s15_s14, 4   ;;  %s1018_s10 = smov %s826_s11 }
 0x14b   : > { %s1019_s11 = smov %s910_s22  ;;  %s1020_s12 = smov %s834_s13 }
 0x14c   : > { %s1021_s13 = smov %s1023_s17  ;;  %14 = sbr.rel (!%p12_p5) target bundleno = 4 (0x4), region = 66 }
 0x153   :  { %588 = vsyncpa [#allocation3], 1 }
 0x154   :  { %590 = vsyncpa [#allocation3 + $0x1], 1 }

</bundles_post_ra>
